<compile_context>
chip_gen: v6e
topology: v6e:2x2x1
jax: 0.10.0
libtpu: 0.0.40
codegen_flags: <defaults>
</compile_context>

<pallas_src>
import functools

import jax
import jax.numpy as jnp
from jax import lax
from jax.experimental import pallas as pl
from jax.experimental.pallas import tpu as pltpu


def _routing_kernel(u_ref, v_ref, b_ref, *, in_nodes, out_nodes, f_size,
                    routing_num, approx, chunk):
    I, O, F = in_nodes, out_nodes, f_size
    inv_o = jnp.float32(1.0 / O)

    def chunks():
        for i0 in range(0, I, chunk):
            yield i0, min(i0 + chunk, I)

    def squash(s):                                       # (O, F) -> (O, F)
        sq = jnp.sum(s * s, axis=-1, keepdims=True)      # (O, 1)   lane reduce
        # sqrt(sq)/(1+sq); gives v == 0 (not NaN) when s == 0
        scale = jnp.sqrt(sq) * pl.reciprocal(1.0 + sq, approx=approx)
        return s * scale

    def write_logit_update(v, first):
        # b[i, o] (+)= sum_f u[i, o, f] * v[o, f]   (lane reduce, chunked over I)
        for i0, i1 in chunks():
            db = jnp.sum(u_ref[i0:i1] * v[None, :, :], axis=-1, keepdims=True)
            b_ref[i0:i1] = db if first else b_ref[i0:i1] + db

    # ---- iteration 0: b == 0  =>  softmax over O is the constant 1/O -------
    s = jnp.zeros((O, F), jnp.float32)
    for i0, i1 in chunks():
        s = s + jnp.sum(u_ref[i0:i1], axis=0)
    v = squash(s * inv_o)
    write_logit_update(v, first=True)                    # b started at zero

    # ---- iterations 1 .. routing_num-1 --------------------------------------
    def routing_iter(_v):
        s = jnp.zeros((O, F), jnp.float32)
        for i0, i1 in chunks():
            bc = b_ref[i0:i1]                            # (ch, O, 1), O on sublanes
            m = jnp.max(bc, axis=1, keepdims=True)       # sublane reduce
            e = jnp.exp(bc - m)                          # EUP
            den = jnp.sum(e, axis=1, keepdims=True)      # sublane reduce
            c = e * pl.reciprocal(den, approx=approx)    # (ch, O, 1)
            # s[o, f] += sum_i c[i, o] * u[i, o, f]
            s = s + jnp.sum(u_ref[i0:i1] * c, axis=0)
        v = squash(s)
        write_logit_update(v, first=False)
        return v

    if routing_num <= 16:
        # routing_num is a small static constant -> full Python unroll keeps
        # the serial chain visible to the scheduler.
        for _ in range(routing_num - 1):
            v = routing_iter(v)
    else:
        v = lax.fori_loop(1, routing_num, lambda _, vv: routing_iter(vv), v,
                          unroll=2)

    v_ref[...] = v


def routing_layer(u_hat, in_nodes, out_nodes, routing_num=1, approx_recip=None):
    """u_hat: (in_nodes*out_nodes, f_size).
    Returns (v: (out_nodes, f_size), b: (in_nodes, out_nodes))."""
    I, O = int(in_nodes), int(out_nodes)
    F = int(u_hat.shape[-1])
    if u_hat.ndim != 2 or u_hat.shape[0] != I * O:
        raise ValueError("expected u_hat of shape (in_nodes*out_nodes, f_size) "
                         "(batch_size=0 path)")
    if routing_num < 1:
        raise ValueError("routing_num must be >= 1")
    if approx_recip is None:
        approx_recip = I >= 128          # exact reciprocal on the tiny/tight path

    # Free view: edge e = i*O + o  ->  u[i, o, :].  No HBM transpose.
    u3 = jnp.asarray(u_hat, jnp.float32).reshape(I, O, F)

    # ---- VMEM sizing (single resident block; include (8,128) lane padding) --
    o_pad = -(-O // 8) * 8
    f_pad = -(-F // 128) * 128
    u_vmem = I * o_pad * f_pad * 4                       # resident u
    misc = 2 * I * o_pad * 128 * 4 + (2 << 20)           # b buffer + headroom
    est_bytes = u_vmem + misc
    try:
        vmem_cap = int(pltpu.get_tpu_info().vmem_capacity_bytes)
    except Exception:
        vmem_cap = 64 << 20                              # conservative (v7x per-core)
    budget = int(0.72 * vmem_cap)
    if est_bytes > budget:
        # TODO(synk): I-streaming path (memory_space=pl.ANY + emit_pipeline) for
        #             u beyond the single-block VMEM budget.
        raise NotImplementedError(
            f"u needs ~{est_bytes / 2**20:.1f} MiB of VMEM, budget is "
            f"{budget / 2**20:.1f} MiB; streaming path not implemented")
    cp_kwargs = {}
    if est_bytes > (12 << 20):   # v5e default scoped VMEM is 16 MiB (v6e/v7x: 32 MiB)
        cp_kwargs["vmem_limit_bytes"] = int(min(budget, est_bytes + (4 << 20)))

    chunk = 64 if I > 64 else I
    kernel = functools.partial(
        _routing_kernel, in_nodes=I, out_nodes=O, f_size=F,
        routing_num=int(routing_num), approx=bool(approx_recip), chunk=chunk)

    v, b3 = pl.pallas_call(
        kernel,
        out_shape=(jax.ShapeDtypeStruct((O, F), jnp.float32),
                   jax.ShapeDtypeStruct((I, O, 1), jnp.float32)),
        in_specs=[pl.BlockSpec((I, O, F), lambda: (0, 0, 0))],
        out_specs=(pl.BlockSpec((O, F), lambda: (0, 0)),
                   pl.BlockSpec((I, O, 1), lambda: (0, 0, 0))),
        compiler_params=pltpu.CompilerParams(**cp_kwargs),
    )(u3)
    # matches the module's edata['b'].view(in_nodes, out_nodes)
    return v, b3.reshape(I, O)


def routing_ref(u_hat, in_nodes, out_nodes, routing_num=1):
    """Pure-JAX reference mirroring the PyTorch/DGL forward (batch_size=0)."""
    I, O = in_nodes, out_nodes
    u = jnp.asarray(u_hat, jnp.float32)                    # (I*O, F)
    b = jnp.zeros((I * O, 1), jnp.float32)
    v = jnp.zeros((O, u.shape[-1]), jnp.float32)
    for _ in range(routing_num):
        c = jax.nn.softmax(b.reshape(I, O), axis=1).reshape(-1, 1)
        cu = c * u                                         # (I*O, F)
        s = cu.reshape(I, O, -1).sum(axis=0)               # (O, F)
        sq = jnp.sum(s ** 2, axis=1, keepdims=True)
        v = sq / (1.0 + sq) * (s / jnp.sqrt(sq))
        v_cat = jnp.tile(v, (I, 1))                        # cat([v]*I, dim=0)
        b = b + jnp.sum(u * v_cat, axis=1, keepdims=True)
    return v, b.reshape(I, O)


if __name__ == "__main__":
    key = jax.random.PRNGKey(0)
    k1, k2 = jax.random.split(key)

    # Case 1: tiny capsule counts -> exact-reciprocal path, fully unrolled.
    in_nodes, out_nodes, f_size, routing_num = 8, 4, 32, 3
    u_hat = jax.random.normal(k1, (in_nodes * out_nodes, f_size), dtype=jnp.float32)
    v, b = routing_layer(u_hat, in_nodes, out_nodes, routing_num=routing_num)
    v, b = jax.block_until_ready((v, b))
    v_ref, b_ref = routing_ref(u_hat, in_nodes, out_nodes, routing_num=routing_num)
    assert jnp.allclose(v, v_ref, atol=1e-5, rtol=1e-5), "v mismatch (small)"
    assert jnp.allclose(b, b_ref, atol=1e-5, rtol=1e-5), "b mismatch (small)"

    # Case 2: larger in_nodes, exact reciprocal (pure f32 VPU/XLU path).
    in_nodes, out_nodes, f_size, routing_num = 256, 8, 16, 6
    u_hat = jax.random.normal(k2, (in_nodes * out_nodes, f_size), dtype=jnp.float32)
    v, b = routing_layer(u_hat, in_nodes, out_nodes, routing_num=routing_num,
                         approx_recip=False)
    v, b = jax.block_until_ready((v, b))
    v_ref, b_ref = routing_ref(u_hat, in_nodes, out_nodes, routing_num=routing_num)
    assert jnp.allclose(v, v_ref, atol=1e-4, rtol=1e-4), "v mismatch (large, exact)"
    assert jnp.allclose(b, b_ref, atol=1e-4, rtol=1e-4), "b mismatch (large, exact)"

    # Case 3: same problem with the approximate-reciprocal (EUP) fast path on
    # the serial softmax/squash chain; validated loosely against the exact run.
    v_a, b_a = routing_layer(u_hat, in_nodes, out_nodes, routing_num=routing_num,
                             approx_recip=True)
    v_a, b_a = jax.block_until_ready((v_a, b_a))
    assert bool(jnp.all(jnp.isfinite(v_a))) and bool(jnp.all(jnp.isfinite(b_a)))
    assert jnp.allclose(v_a, v, atol=5e-2, rtol=5e-2), "v mismatch (approx vs exact)"
    assert jnp.allclose(b_a, b, atol=5e-2, rtol=5e-2), "b mismatch (approx vs exact)"

    print("KERNEL_OK")
</pallas_src>

<mosaic_0001>
module attributes {stable_mosaic.version = 11 : i64} {
  func.func @_routing_kernel(%arg0: memref<8x4x32xf32, #tpu.memory_space<vmem>>, %arg1: memref<4x32xf32, #tpu.memory_space<vmem>>, %arg2: memref<8x4x1xf32, #tpu.memory_space<vmem>>) attributes {dimension_semantics = [], scalar_prefetch = 0 : i64, scratch_operands = 0 : i64, tpu.core_type = #tpu.core_type<tc>} {
    %cst = arith.constant 0.000000e+00 : f32
    %0 = vector.broadcast %cst : f32 to vector<4x32xf32>
    %c0 = arith.constant 0 : index
    %c0_0 = arith.constant 0 : index
    %c0_1 = arith.constant 0 : index
    %1 = vector.load %arg0[%c0, %c0_0, %c0_1] : memref<8x4x32xf32, #tpu.memory_space<vmem>>, vector<8x4x32xf32>
    %cst_2 = arith.constant dense<0.000000e+00> : vector<4x32xf32>
    %2 = vector.multi_reduction <add>, %1, %cst_2 [0] : vector<8x4x32xf32> to vector<4x32xf32>
    %3 = arith.addf %0, %2 : vector<4x32xf32>
    %cst_3 = arith.constant 2.500000e-01 : f32
    %4 = vector.broadcast %cst_3 : f32 to vector<4x32xf32>
    %5 = arith.mulf %3, %4 : vector<4x32xf32>
    %6 = arith.mulf %5, %5 : vector<4x32xf32>
    %cst_4 = arith.constant dense<0.000000e+00> : vector<4xf32>
    %7 = vector.multi_reduction <add>, %6, %cst_4 [1] : vector<4x32xf32> to vector<4xf32>
    %8 = vector.shape_cast %7 : vector<4xf32> to vector<4x1xf32>
    %9 = math.sqrt %8 : vector<4x1xf32>
    %cst_5 = arith.constant 1.000000e+00 : f32
    %10 = vector.broadcast %cst_5 : f32 to vector<4x1xf32>
    %11 = arith.addf %10, %8 : vector<4x1xf32>
    %12 = tpu.reciprocal %11 : vector<4x1xf32> -> vector<4x1xf32>
    %13 = arith.mulf %9, %12 : vector<4x1xf32>
    %14 = vector.broadcast %13 : vector<4x1xf32> to vector<4x32xf32>
    %15 = arith.mulf %5, %14 : vector<4x32xf32>
    %c0_6 = arith.constant 0 : index
    %c0_7 = arith.constant 0 : index
    %c0_8 = arith.constant 0 : index
    %16 = vector.load %arg0[%c0_6, %c0_7, %c0_8] : memref<8x4x32xf32, #tpu.memory_space<vmem>>, vector<8x4x32xf32>
    %17 = vector.shape_cast %15 : vector<4x32xf32> to vector<1x4x32xf32>
    %18 = vector.broadcast %17 : vector<1x4x32xf32> to vector<8x4x32xf32>
    %19 = arith.mulf %16, %18 : vector<8x4x32xf32>
    %cst_9 = arith.constant dense<0.000000e+00> : vector<8x4xf32>
    %20 = vector.multi_reduction <add>, %19, %cst_9 [2] : vector<8x4x32xf32> to vector<8x4xf32>
    %21 = vector.shape_cast %20 : vector<8x4xf32> to vector<8x4x1xf32>
    %c0_10 = arith.constant 0 : index
    %c0_11 = arith.constant 0 : index
    %c0_12 = arith.constant 0 : index
    %22 = vector.load %arg2[%c0_10, %c0_11, %c0_12] : memref<8x4x1xf32, #tpu.memory_space<vmem>>, vector<8x4x1xf32>
    tpu.vector_store %arg2[%c0_10, %c0_11, %c0_12], %21 {strides = array<i32>} : memref<8x4x1xf32, #tpu.memory_space<vmem>>, vector<8x4x1xf32>,
    %cst_13 = arith.constant 0.000000e+00 : f32
    %23 = vector.broadcast %cst_13 : f32 to vector<4x32xf32>
    %c0_14 = arith.constant 0 : index
    %c0_15 = arith.constant 0 : index
    %c0_16 = arith.constant 0 : index
    %24 = vector.load %arg2[%c0_14, %c0_15, %c0_16] : memref<8x4x1xf32, #tpu.memory_space<vmem>>, vector<8x4x1xf32>
    %cst_17 = arith.constant dense<0xFF800000> : vector<8x1xf32>
    %25 = vector.multi_reduction <maximumf>, %24, %cst_17 [1] : vector<8x4x1xf32> to vector<8x1xf32>
    %26 = vector.shape_cast %25 : vector<8x1xf32> to vector<8x1x1xf32>
    %27 = vector.broadcast %26 : vector<8x1x1xf32> to vector<8x4x1xf32>
    %28 = arith.subf %24, %27 : vector<8x4x1xf32>
    %29 = math.exp %28 : vector<8x4x1xf32>
    %cst_18 = arith.constant dense<0.000000e+00> : vector<8x1xf32>
    %30 = vector.multi_reduction <add>, %29, %cst_18 [1] : vector<8x4x1xf32> to vector<8x1xf32>
    %31 = vector.shape_cast %30 : vector<8x1xf32> to vector<8x1x1xf32>
    %32 = tpu.reciprocal %31 : vector<8x1x1xf32> -> vector<8x1x1xf32>
    %33 = vector.broadcast %32 : vector<8x1x1xf32> to vector<8x4x1xf32>
    %34 = arith.mulf %29, %33 : vector<8x4x1xf32>
    %c0_19 = arith.constant 0 : index
    %c0_20 = arith.constant 0 : index
    %c0_21 = arith.constant 0 : index
    %35 = vector.load %arg0[%c0_19, %c0_20, %c0_21] : memref<8x4x32xf32, #tpu.memory_space<vmem>>, vector<8x4x32xf32>
    %36 = vector.broadcast %34 : vector<8x4x1xf32> to vector<8x4x32xf32>
    %37 = arith.mulf %35, %36 : vector<8x4x32xf32>
    %cst_22 = arith.constant dense<0.000000e+00> : vector<4x32xf32>
    %38 = vector.multi_reduction <add>, %37, %cst_22 [0] : vector<8x4x32xf32> to vector<4x32xf32>
    %39 = arith.addf %23, %38 : vector<4x32xf32>
    %40 = arith.mulf %39, %39 : vector<4x32xf32>
    %cst_23 = arith.constant dense<0.000000e+00> : vector<4xf32>
    %41 = vector.multi_reduction <add>, %40, %cst_23 [1] : vector<4x32xf32> to vector<4xf32>
    %42 = vector.shape_cast %41 : vector<4xf32> to vector<4x1xf32>
    %43 = math.sqrt %42 : vector<4x1xf32>
    %cst_24 = arith.constant 1.000000e+00 : f32
    %44 = vector.broadcast %cst_24 : f32 to vector<4x1xf32>
    %45 = arith.addf %44, %42 : vector<4x1xf32>
    %46 = tpu.reciprocal %45 : vector<4x1xf32> -> vector<4x1xf32>
    %47 = arith.mulf %43, %46 : vector<4x1xf32>
    %48 = vector.broadcast %47 : vector<4x1xf32> to vector<4x32xf32>
    %49 = arith.mulf %39, %48 : vector<4x32xf32>
    %c0_25 = arith.constant 0 : index
    %c0_26 = arith.constant 0 : index
    %c0_27 = arith.constant 0 : index
    %50 = vector.load %arg0[%c0_25, %c0_26, %c0_27] : memref<8x4x32xf32, #tpu.memory_space<vmem>>, vector<8x4x32xf32>
    %51 = vector.shape_cast %49 : vector<4x32xf32> to vector<1x4x32xf32>
    %52 = vector.broadcast %51 : vector<1x4x32xf32> to vector<8x4x32xf32>
    %53 = arith.mulf %50, %52 : vector<8x4x32xf32>
    %cst_28 = arith.constant dense<0.000000e+00> : vector<8x4xf32>
    %54 = vector.multi_reduction <add>, %53, %cst_28 [2] : vector<8x4x32xf32> to vector<8x4xf32>
    %55 = vector.shape_cast %54 : vector<8x4xf32> to vector<8x4x1xf32>
    %c0_29 = arith.constant 0 : index
    %c0_30 = arith.constant 0 : index
    %c0_31 = arith.constant 0 : index
    %56 = vector.load %arg2[%c0_29, %c0_30, %c0_31] : memref<8x4x1xf32, #tpu.memory_space<vmem>>, vector<8x4x1xf32>
    %57 = arith.addf %56, %55 : vector<8x4x1xf32>
    %c0_32 = arith.constant 0 : index
    %c0_33 = arith.constant 0 : index
    %c0_34 = arith.constant 0 : index
    %58 = vector.load %arg2[%c0_32, %c0_33, %c0_34] : memref<8x4x1xf32, #tpu.memory_space<vmem>>, vector<8x4x1xf32>
    tpu.vector_store %arg2[%c0_32, %c0_33, %c0_34], %57 {strides = array<i32>} : memref<8x4x1xf32, #tpu.memory_space<vmem>>, vector<8x4x1xf32>,
    %cst_35 = arith.constant 0.000000e+00 : f32
    %59 = vector.broadcast %cst_35 : f32 to vector<4x32xf32>
    %c0_36 = arith.constant 0 : index
    %c0_37 = arith.constant 0 : index
    %c0_38 = arith.constant 0 : index
    %60 = vector.load %arg2[%c0_36, %c0_37, %c0_38] : memref<8x4x1xf32, #tpu.memory_space<vmem>>, vector<8x4x1xf32>
    %cst_39 = arith.constant dense<0xFF800000> : vector<8x1xf32>
    %61 = vector.multi_reduction <maximumf>, %60, %cst_39 [1] : vector<8x4x1xf32> to vector<8x1xf32>
    %62 = vector.shape_cast %61 : vector<8x1xf32> to vector<8x1x1xf32>
    %63 = vector.broadcast %62 : vector<8x1x1xf32> to vector<8x4x1xf32>
    %64 = arith.subf %60, %63 : vector<8x4x1xf32>
    %65 = math.exp %64 : vector<8x4x1xf32>
    %cst_40 = arith.constant dense<0.000000e+00> : vector<8x1xf32>
    %66 = vector.multi_reduction <add>, %65, %cst_40 [1] : vector<8x4x1xf32> to vector<8x1xf32>
    %67 = vector.shape_cast %66 : vector<8x1xf32> to vector<8x1x1xf32>
    %68 = tpu.reciprocal %67 : vector<8x1x1xf32> -> vector<8x1x1xf32>
    %69 = vector.broadcast %68 : vector<8x1x1xf32> to vector<8x4x1xf32>
    %70 = arith.mulf %65, %69 : vector<8x4x1xf32>
    %c0_41 = arith.constant 0 : index
    %c0_42 = arith.constant 0 : index
    %c0_43 = arith.constant 0 : index
    %71 = vector.load %arg0[%c0_41, %c0_42, %c0_43] : memref<8x4x32xf32, #tpu.memory_space<vmem>>, vector<8x4x32xf32>
    %72 = vector.broadcast %70 : vector<8x4x1xf32> to vector<8x4x32xf32>
    %73 = arith.mulf %71, %72 : vector<8x4x32xf32>
    %cst_44 = arith.constant dense<0.000000e+00> : vector<4x32xf32>
    %74 = vector.multi_reduction <add>, %73, %cst_44 [0] : vector<8x4x32xf32> to vector<4x32xf32>
    %75 = arith.addf %59, %74 : vector<4x32xf32>
    %76 = arith.mulf %75, %75 : vector<4x32xf32>
    %cst_45 = arith.constant dense<0.000000e+00> : vector<4xf32>
    %77 = vector.multi_reduction <add>, %76, %cst_45 [1] : vector<4x32xf32> to vector<4xf32>
    %78 = vector.shape_cast %77 : vector<4xf32> to vector<4x1xf32>
    %79 = math.sqrt %78 : vector<4x1xf32>
    %cst_46 = arith.constant 1.000000e+00 : f32
    %80 = vector.broadcast %cst_46 : f32 to vector<4x1xf32>
    %81 = arith.addf %80, %78 : vector<4x1xf32>
    %82 = tpu.reciprocal %81 : vector<4x1xf32> -> vector<4x1xf32>
    %83 = arith.mulf %79, %82 : vector<4x1xf32>
    %84 = vector.broadcast %83 : vector<4x1xf32> to vector<4x32xf32>
    %85 = arith.mulf %75, %84 : vector<4x32xf32>
    %c0_47 = arith.constant 0 : index
    %c0_48 = arith.constant 0 : index
    %c0_49 = arith.constant 0 : index
    %86 = vector.load %arg0[%c0_47, %c0_48, %c0_49] : memref<8x4x32xf32, #tpu.memory_space<vmem>>, vector<8x4x32xf32>
    %87 = vector.shape_cast %85 : vector<4x32xf32> to vector<1x4x32xf32>
    %88 = vector.broadcast %87 : vector<1x4x32xf32> to vector<8x4x32xf32>
    %89 = arith.mulf %86, %88 : vector<8x4x32xf32>
    %cst_50 = arith.constant dense<0.000000e+00> : vector<8x4xf32>
    %90 = vector.multi_reduction <add>, %89, %cst_50 [2] : vector<8x4x32xf32> to vector<8x4xf32>
    %91 = vector.shape_cast %90 : vector<8x4xf32> to vector<8x4x1xf32>
    %c0_51 = arith.constant 0 : index
    %c0_52 = arith.constant 0 : index
    %c0_53 = arith.constant 0 : index
    %92 = vector.load %arg2[%c0_51, %c0_52, %c0_53] : memref<8x4x1xf32, #tpu.memory_space<vmem>>, vector<8x4x1xf32>
    %93 = arith.addf %92, %91 : vector<8x4x1xf32>
    %c0_54 = arith.constant 0 : index
    %c0_55 = arith.constant 0 : index
    %c0_56 = arith.constant 0 : index
    %94 = vector.load %arg2[%c0_54, %c0_55, %c0_56] : memref<8x4x1xf32, #tpu.memory_space<vmem>>, vector<8x4x1xf32>
    tpu.vector_store %arg2[%c0_54, %c0_55, %c0_56], %93 {strides = array<i32>} : memref<8x4x1xf32, #tpu.memory_space<vmem>>, vector<8x4x1xf32>,
    %c0_57 = arith.constant 0 : index
    %c0_58 = arith.constant 0 : index
    %95 = vector.load %arg1[%c0_57, %c0_58] : memref<4x32xf32, #tpu.memory_space<vmem>>, vector<4x32xf32>
    tpu.vector_store %arg1[%c0_57, %c0_58], %85 {strides = array<i32>} : memref<4x32xf32, #tpu.memory_space<vmem>>, vector<4x32xf32>,
    return
  }
}

</mosaic_0001>

<bundles_post_ra>
// kernel: tpu_custom_call.1
= control target key start
LH: loop header
LB: loop body
LE: loop exit
PB: predicated region body
PF: predicated region fallthrough
CT: control target
= control target key end

     0   :  { %8 = vsyncpa [#allocation3], 0  ;;  %s1226_s0 = inlined_call_operand.hbm [shape: f32[8,4,32], index: 0, kind: input, shape index: {}]   ;;  %s1227_s1 = inlined_call_operand.hbm [shape: f32[4,32], index: 1, kind: output, shape index: {0}]   ;;  %s1228_s2 = inlined_call_operand.vmem [shape: f32[8,4,1], index: 2, kind: output, shape index: {1}]  }
   0x1   :  { %9 = vsyncpa [#allocation4], 0  ;;  %s844_s9 = smov [#allocation2]  }
   0x2   :  { %s15_s10 = sshll.u32 %s844_s9, 4  ;;  %s16_s10 = int_to_ptr.vmem [resolvable:$true] %s15_s10 }
   0x3   :  { %s808_s11 = scalar_lea.vmem %s16_s10, 512  ;;  %p813_p1 = scmp.lt.s32.totalorder %s16_s10, %s16_s10 }
   0x4   :  { %p809_p0 = scmp.ne.s32.totalorder %s16_s10, %s808_s11  ;;  %p814_p2 = scmp.lt.s32.totalorder %s808_s11, %s808_s11 }
   0x6   :  { %p815_p3 = por %p814_p2, %p813_p1 }
   0x8   :  { %p816_p4 = pnand %p815_p3, %p809_p0 }
   0xa   :  { %819 = shalt.err (!%p816_p4)
}
   0xb   :  { %s845_s12 = smov 64   ;;  %s846_s13 = smov 4  }
   0xc   :  { %21 = dma.hbm_to_vmem [thread:$0]  %s1226_s0, 512, %s16_s10, [#allocation3], %s845_s12, %s845_s12, %s846_s13  }
   0xd   :  { %840 = dma.done.wait [#allocation3], 512  }
   0xe   :  { %841 = vsyncadd [#allocation3], 4294966784  ;;  %vm33_vm0 = vcmask 257024   ;;  %v25_v0 = vld [vmem:[#allocation2] sm:$0xf]  ;;  %v847_v52 = vmov 0  }
   0xf   :  { %v26_v1 = vld [vmem:[#allocation2 + $0x4] sm:$0xf]  ;;  %v27_v2 = vld [vmem:[#allocation2 + $0x8] sm:$0xf]  ;;  %v28_v3 = vld [vmem:[#allocation2 + $0xc] sm:$0xf]  ;;  %723 = vset.pattern.permute.xlu0 %v847_v52  ;;  %722 = vset.pattern.permute.xlu1 %v847_v52 }
  0x10   :  { %v34_v4 = vsel %vm33_vm0, %v25_v0, 0.0  ;;  %v35_v5 = vsel %vm33_vm0, %v26_v1, 0.0  ;;  %v29_v6 = vld [vmem:[#allocation2 + $0x10] sm:$0xf]  ;;  %v37_v8 = vsel %vm33_vm0, %v27_v2, 0.0  ;;  %v39_v9 = vsel %vm33_vm0, %v28_v3, 0.0 }
  0x11   :  { %v36_v7 = vadd.f32 %v35_v5, %v34_v4  ;;  %v30_v10 = vld [vmem:[#allocation2 + $0x14] sm:$0xf]  ;;  %v41_v12 = vsel %vm33_vm0, %v29_v6, 0.0  ;;  %v31_v13 = vld [vmem:[#allocation2 + $0x18] sm:$0xf]  ;;  %vm98_vm3 = vcmask 3072  }
  0x12   :  { %v43_v15 = vsel %vm33_vm0, %v30_v10, 0.0  ;;  %v32_v16 = vld [vmem:[#allocation2 + $0x1c] sm:$0xf]  ;;  %v45_v18 = vsel %vm33_vm0, %v31_v13, 0.0  ;;  %s848_s21 = smov [#allocation5]  }
  0x13   :  { %v38_v11 = vadd.f32 %v37_v8, %v36_v7  ;;  %v47_v20 = vsel %vm33_vm0, %v32_v16, 0.0  ;;  %s704_s22 = sshll.u32 %s848_s21, 4  ;;  %s705_s22 = int_to_ptr.vmem [resolvable:$true] %s704_s22 }
  0x14   :  { %s820_s23 = scalar_lea.vmem %s705_s22, 64  ;;  %p825_p6 = scmp.lt.s32.totalorder %s705_s22, %s705_s22 }
  0x15   :  { %v40_v14 = vadd.f32 %v39_v9, %v38_v11  ;;  %p821_p5 = scmp.ne.s32.totalorder %s705_s22, %s820_s23  ;;  %p826_p7 = scmp.lt.s32.totalorder %s820_s23, %s820_s23 }
  0x17   :  { %v42_v17 = vadd.f32 %v41_v12, %v40_v14  ;;  %p827_p8 = por %p826_p7, %p825_p6 }
  0x19   :  { %v44_v19 = vadd.f32 %v43_v15, %v42_v17  ;;  %p828_p9 = pnand %p827_p8, %p821_p5 }
  0x1b   :  { %v46_v21 = vadd.f32 %v45_v18, %v44_v19 }
  0x1d   :  { %v48_v22 = vadd.f32 %v47_v20, %v46_v21 }
  0x1f   :  { %v50_v23 = vmul.f32 0.25, %v48_v22 }
  0x21   :  { %v51_v24 = vmul.f32 %v50_v23, %v50_v23 }
  0x23   :  { %v52_v25 = vsel %vm33_vm0, %v51_v24, 0.0 }
  0x24   :  { %53 = vadd.xlane.f32.xlu0 %v52_v25 }
  0xad   :  { %v54_v26 = vpop.xlane.xlu0 %53 }
  0xae   :  { %724 = vrsqrt.f32 %v54_v26  ;;  %v62_v27 = vadd.f32 1.0, %v54_v26  ;;  %vm57_vm1 = vcmp.eq.f32.partialorder %v54_v26, inf  ;;  %v60_v30 = vand.u32 2147483648, %v54_v26 }
  0xaf   :  { %vm59_vm2 = vcmp.eq.f32.partialorder %v54_v26, 0.0 }
  0xb0   :  { %726 = vrcp.f32 %v62_v27 }
  0xbb   :  { %v725_v28 = vpop.eup %724 }
  0xbc   :  { %v56_v29 = vmul.f32 %v725_v28, %v54_v26 }
  0xbd   :  { %v727_v32 = vpop.eup %726 }
  0xbe   :  { %v58_v31 = vsel %vm57_vm1, %v54_v26, %v56_v29 }
  0xbf   :  { %v61_v33 = vsel %vm59_vm2, %v60_v30, %v58_v31 }
  0xc0   :  { %v64_v34 = vmul.f32 %v727_v32, %v61_v33 }
  0xc2   :  { %v65_v35 = vmul.f32 %v64_v34, %v50_v23 }
  0xc4   :  { %v67_v36 = vmul.f32 %v65_v35, %v26_v1  ;;  %v66_v37 = vmul.f32 %v65_v35, %v25_v0  ;;  %v68_v40 = vmul.f32 %v65_v35, %v27_v2  ;;  %v69_v41 = vmul.f32 %v65_v35, %v28_v3 }
  0xc5   :  { %v70_v44 = vmul.f32 %v65_v35, %v29_v6  ;;  %v71_v45 = vmul.f32 %v65_v35, %v30_v10  ;;  %v72_v48 = vmul.f32 %v65_v35, %v31_v13  ;;  %v73_v49 = vmul.f32 %v65_v35, %v32_v16 }
  0xc6   :  { %v77_v38 = vsel %vm33_vm0, %v67_v36, 0.0  ;;  %v74_v39 = vsel %vm33_vm0, %v66_v37, 0.0  ;;  %v80_v42 = vsel %vm33_vm0, %v68_v40, 0.0  ;;  %v83_v43 = vsel %vm33_vm0, %v69_v41, 0.0 }
  0xc7   :  { %78 = vadd.xlane.f32.xlu1 %v77_v38  ;;  %75 = vadd.xlane.f32.xlu0 %v74_v39  ;;  %v86_v46 = vsel %vm33_vm0, %v70_v44, 0.0  ;;  %v89_v47 = vsel %vm33_vm0, %v71_v45, 0.0  ;;  %v92_v50 = vsel %vm33_vm0, %v72_v48, 0.0  ;;  %v95_v51 = vsel %vm33_vm0, %v73_v49, 0.0 }
  0xcb   :  { %81 = vadd.xlane.f32.xlu1 %v80_v42  ;;  %84 = vadd.xlane.f32.xlu0 %v83_v43 }
  0xcf   :  { %87 = vadd.xlane.f32.xlu1 %v86_v46  ;;  %90 = vadd.xlane.f32.xlu0 %v89_v47 }
  0xd3   :  { %93 = vadd.xlane.f32.xlu1 %v92_v50  ;;  %96 = vadd.xlane.f32.xlu0 %v95_v51 }
 0x150   :  { %v79_v53 = vpop.xlane.xlu1 %78  ;;  %v76_v54 = vpop.xlane.xlu0 %75 }
 0x151   :  { %100 = vst.msk [vmem:[%s1228_s2 + $0x4] sm:$0xf] %vm98_vm3, %v79_v53  ;;  %99 = vst.msk [vmem:[%s1228_s2] sm:$0xf] %vm98_vm3, %v76_v54 }
 0x154   :  { %v82_v55 = vpop.xlane.xlu1 %81  ;;  %v85_v56 = vpop.xlane.xlu0 %84 }
 0x155   :  { %101 = vst.msk [vmem:[%s1228_s2 + $0x8] sm:$0xf] %vm98_vm3, %v82_v55  ;;  %102 = vst.msk [vmem:[%s1228_s2 + $0xc] sm:$0xf] %vm98_vm3, %v85_v56 }
 0x158   :  { %v88_v57 = vpop.xlane.xlu1 %87  ;;  %v91_v58 = vpop.xlane.xlu0 %90  ;;  %v903_v59 = vld [vmem:[%s1228_s2 + $0x4] sm:$0xf]  ;;  %v908_v60 = vld [vmem:[%s1228_s2] sm:$0xf] }
 0x159   :  { %103 = vst.msk [vmem:[%s1228_s2 + $0x10] sm:$0xf] %vm98_vm3, %v88_v57  ;;  %104 = vst.msk [vmem:[%s1228_s2 + $0x14] sm:$0xf] %vm98_vm3, %v91_v58  ;;  %v122_v61 = vsel %vm98_vm3, %v903_v59, -inf  ;;  %v115_v62 = vsel %vm98_vm3, %v908_v60, -inf }
 0x15a   :  { %v123_v63 = vrot.slane %v122_v61, 4  ;;  %v116_v0 = vrot.slane %v115_v62, 4 }
 0x15c   :  { %v94_v1 = vpop.xlane.xlu1 %93  ;;  %v97_v2 = vpop.xlane.xlu0 %96  ;;  %v124_v3 = vmax.f32 %v122_v61, %v123_v63  ;;  %v117_v4 = vmax.f32 %v115_v62, %v116_v0  ;;  %v925_v5 = vld [vmem:[%s1228_s2 + $0x8] sm:$0xf]  ;;  %v930_v6 = vld [vmem:[%s1228_s2 + $0xc] sm:$0xf] }
 0x15d   :  { %105 = vst.msk [vmem:[%s1228_s2 + $0x18] sm:$0xf] %vm98_vm3, %v94_v1  ;;  %106 = vst.msk [vmem:[%s1228_s2 + $0x1c] sm:$0xf] %vm98_vm3, %v97_v2  ;;  %v129_v7 = vsel %vm98_vm3, %v925_v5, -inf  ;;  %v136_v8 = vsel %vm98_vm3, %v930_v6, -inf }
 0x15e   :  { %v125_v9 = vrot.slane %v124_v3, 2  ;;  %v118_v10 = vrot.slane %v117_v4, 2  ;;  %v130_v11 = vrot.slane %v129_v7, 4  ;;  %v137_v12 = vrot.slane %v136_v8, 4 }
 0x160   :  { %v126_v13 = vmax.f32 %v124_v3, %v125_v9  ;;  %v119_v14 = vmax.f32 %v117_v4, %v118_v10  ;;  %v131_v15 = vmax.f32 %v129_v7, %v130_v11  ;;  %v138_v16 = vmax.f32 %v136_v8, %v137_v12  ;;  %v947_v17 = vld [vmem:[%s1228_s2 + $0x10] sm:$0xf]  ;;  %v952_v18 = vld [vmem:[%s1228_s2 + $0x14] sm:$0xf] }
 0x161   :  { %v143_v19 = vsel %vm98_vm3, %v947_v17, -inf  ;;  %v150_v20 = vsel %vm98_vm3, %v952_v18, -inf }
 0x162   :  { %v127_v21 = vrot.slane %v126_v13, 1  ;;  %v120_v22 = vrot.slane %v119_v14, 1  ;;  %v132_v23 = vrot.slane %v131_v15, 2  ;;  %v139_v24 = vrot.slane %v138_v16, 2 }
 0x163   :  { %v144_v25 = vrot.slane %v143_v19, 4  ;;  %v151_v26 = vrot.slane %v150_v20, 4 }
 0x164   :  { %v128_v27 = vmax.f32 %v126_v13, %v127_v21  ;;  %v121_v28 = vmax.f32 %v119_v14, %v120_v22  ;;  %v133_v29 = vmax.f32 %v131_v15, %v132_v23  ;;  %v140_v30 = vmax.f32 %v138_v16, %v139_v24  ;;  %v961_v31 = vld [vmem:[%s1228_s2 + $0x18] sm:$0xf]  ;;  %v966_v32 = vld [vmem:[%s1228_s2 + $0x1c] sm:$0xf] }
 0x165   :  { %v145_v33 = vmax.f32 %v143_v19, %v144_v25  ;;  %v152_v34 = vmax.f32 %v150_v20, %v151_v26  ;;  %v157_v35 = vsel %vm98_vm3, %v961_v31, -inf  ;;  %v164_v36 = vsel %vm98_vm3, %v966_v32, -inf }
 0x166   :  { %v172_v37 = vsub.f32 %v903_v59, %v128_v27  ;;  %v171_v38 = vsub.f32 %v908_v60, %v121_v28  ;;  %v134_v39 = vrot.slane %v133_v29, 1  ;;  %v141_v40 = vrot.slane %v140_v30, 1 }
 0x167   :  { %v146_v41 = vrot.slane %v145_v33, 2  ;;  %v153_v42 = vrot.slane %v152_v34, 2  ;;  %v158_v43 = vrot.slane %v157_v35, 4  ;;  %v165_v44 = vrot.slane %v164_v36, 4 }
 0x168   :  { %v181_v45 = vmul.f32 1.442695, %v172_v37  ;;  %v179_v46 = vmul.f32 1.442695, %v171_v38  ;;  %v135_v47 = vmax.f32 %v133_v29, %v134_v39  ;;  %v142_v48 = vmax.f32 %v140_v30, %v141_v40 }
 0x169   :  { %v147_v49 = vmax.f32 %v145_v33, %v146_v41  ;;  %v154_v50 = vmax.f32 %v152_v34, %v153_v42  ;;  %v159_v51 = vmax.f32 %v157_v35, %v158_v43  ;;  %v166_v52 = vmax.f32 %v164_v36, %v165_v44 }
 0x16a   :  { %728 = vpow2.f32 %v181_v45  ;;  %v173_v53 = vsub.f32 %v925_v5, %v135_v47  ;;  %v174_v54 = vsub.f32 %v930_v6, %v142_v48 }
 0x16b   :  { %730 = vpow2.f32 %v179_v46  ;;  %v148_v55 = vrot.slane %v147_v49, 1  ;;  %v155_v56 = vrot.slane %v154_v50, 1  ;;  %v160_v57 = vrot.slane %v159_v51, 2 }
 0x16c   :  { %v183_v58 = vmul.f32 1.442695, %v173_v53  ;;  %v185_v61 = vmul.f32 1.442695, %v174_v54  ;;  %v167_v62 = vrot.slane %v166_v52, 2 }
 0x16d   :  { %v149_v63 = vmax.f32 %v147_v49, %v148_v55  ;;  %v156_v0 = vmax.f32 %v154_v50, %v155_v56  ;;  %v161_v1 = vmax.f32 %v159_v51, %v160_v57 }
 0x16e   :  { %732 = vpow2.f32 %v183_v58  ;;  %v168_v2 = vmax.f32 %v166_v52, %v167_v62 }
 0x16f   :  { %734 = vpow2.f32 %v185_v61  ;;  %v175_v3 = vsub.f32 %v947_v17, %v149_v63  ;;  %v176_v4 = vsub.f32 %v952_v18, %v156_v0  ;;  %v162_v7 = vrot.slane %v161_v1, 1 }
 0x170   :  { %v169_v8 = vrot.slane %v168_v2, 1 }
 0x171   :  { %v187_v9 = vmul.f32 1.442695, %v175_v3  ;;  %v189_v10 = vmul.f32 1.442695, %v176_v4  ;;  %v163_v11 = vmax.f32 %v161_v1, %v162_v7 }
 0x172   :  { %v170_v12 = vmax.f32 %v168_v2, %v169_v8 }
 0x173   :  { %736 = vpow2.f32 %v187_v9  ;;  %v177_v13 = vsub.f32 %v961_v31, %v163_v11 }
 0x174   :  { %738 = vpow2.f32 %v189_v10  ;;  %v178_v14 = vsub.f32 %v966_v32, %v170_v12 }
 0x175   :  { %v191_v15 = vmul.f32 1.442695, %v177_v13 }
 0x176   :  { %v193_v16 = vmul.f32 1.442695, %v178_v14 }
 0x177   :  { %v980_v19 = vpop.eup %728  ;;  %740 = vpow2.f32 %v191_v15 }
 0x178   :  { %v982_v20 = vpop.eup %730  ;;  %v202_v21 = vsel %vm98_vm3, %v980_v19, 0.0  ;;  %742 = vpow2.f32 %v193_v16 }
 0x179   :  { %v203_v22 = vrot.slane %v202_v21, 4  ;;  %v195_v23 = vsel %vm98_vm3, %v982_v20, 0.0 }
 0x17a   :  { %v196_v24 = vrot.slane %v195_v23, 4 }
 0x17b   :  { %v988_v25 = vpop.eup %732  ;;  %v204_v26 = vadd.f32 %v203_v22, %v202_v21 }
 0x17c   :  { %v990_v27 = vpop.eup %734  ;;  %v197_v28 = vadd.f32 %v196_v24, %v195_v23  ;;  %v209_v29 = vsel %vm98_vm3, %v988_v25, 0.0 }
 0x17d   :  { %v205_v30 = vrot.slane %v204_v26, 2  ;;  %v210_v33 = vrot.slane %v209_v29, 4  ;;  %v216_v34 = vsel %vm98_vm3, %v990_v27, 0.0 }
 0x17e   :  { %v198_v35 = vrot.slane %v197_v28, 2  ;;  %v217_v36 = vrot.slane %v216_v34, 4 }
 0x17f   :  { %v206_v37 = vadd.f32 %v205_v30, %v204_v26  ;;  %v211_v38 = vadd.f32 %v210_v33, %v209_v29 }
 0x180   :  { %v996_v39 = vpop.eup %736  ;;  %v199_v40 = vadd.f32 %v198_v35, %v197_v28  ;;  %v218_v41 = vadd.f32 %v217_v36, %v216_v34 }
 0x181   :  { %v998_v42 = vpop.eup %738  ;;  %v207_v43 = vrot.slane %v206_v37, 1  ;;  %v212_v44 = vrot.slane %v211_v38, 2  ;;  %v223_v45 = vsel %vm98_vm3, %v996_v39, 0.0 }
 0x182   :  { %v200_v46 = vrot.slane %v199_v40, 1  ;;  %v219_v47 = vrot.slane %v218_v41, 2  ;;  %v224_v48 = vrot.slane %v223_v45, 4  ;;  %v230_v49 = vsel %vm98_vm3, %v998_v42, 0.0 }
 0x183   :  { %v208_v50 = vadd.f32 %v207_v43, %v206_v37  ;;  %v213_v51 = vadd.f32 %v212_v44, %v211_v38  ;;  %v231_v52 = vrot.slane %v230_v49, 4 }
 0x184   :  { %v741_v53 = vpop.eup %740  ;;  %v201_v54 = vadd.f32 %v200_v46, %v199_v40  ;;  %v220_v55 = vadd.f32 %v219_v47, %v218_v41  ;;  %v225_v56 = vadd.f32 %v224_v48, %v223_v45 }
 0x185   :  { %v743_v57 = vpop.eup %742  ;;  %744 = vrcp.f32 %v208_v50  ;;  %v214_v58 = vrot.slane %v213_v51, 1  ;;  %v232_v61 = vadd.f32 %v231_v52, %v230_v49  ;;  %v237_v62 = vsel %vm98_vm3, %v741_v53, 0.0  ;;  %v267_v50 = vld [vmem:[#allocation2] sm:$0xf]  ;;  %v269_v52 = vld [vmem:[#allocation2 + $0x8] sm:$0xf] }
 0x186   :  { %746 = vrcp.f32 %v201_v54  ;;  %v221_v63 = vrot.slane %v220_v55, 1  ;;  %v226_v0 = vrot.slane %v225_v56, 2  ;;  %v238_v1 = vrot.slane %v237_v62, 4 }
 0x187   :  { %v215_v2 = vadd.f32 %v214_v58, %v213_v51  ;;  %v233_v3 = vrot.slane %v232_v61, 2  ;;  %v244_v4 = vsel %vm98_vm3, %v743_v57, 0.0 }
 0x188   :  { %v222_v7 = vadd.f32 %v221_v63, %v220_v55  ;;  %v227_v8 = vadd.f32 %v226_v0, %v225_v56  ;;  %v239_v9 = vadd.f32 %v238_v1, %v237_v62  ;;  %v245_v10 = vrot.slane %v244_v4, 4  ;;  %v270_v56 = vld [vmem:[#allocation2 + $0xc] sm:$0xf] }
 0x189   :  { %748 = vrcp.f32 %v215_v2  ;;  %v234_v11 = vadd.f32 %v233_v3, %v232_v61  ;;  %v271_v61 = vld [vmem:[#allocation2 + $0x10] sm:$0xf] }
 0x18a   :  { %v228_v12 = vrot.slane %v227_v8, 1  ;;  %v240_v13 = vrot.slane %v239_v9, 2  ;;  %v246_v14 = vadd.f32 %v245_v10, %v244_v4  ;;  %750 = vrcp.f32 %v222_v7 }
 0x18b   :  { %v235_v16 = vrot.slane %v234_v11, 1 }
 0x18c   :  { %v229_v15 = vadd.f32 %v228_v12, %v227_v8  ;;  %v241_v21 = vadd.f32 %v240_v13, %v239_v9  ;;  %v247_v22 = vrot.slane %v246_v14, 2  ;;  %v273_v9 = vld [vmem:[#allocation2 + $0x18] sm:$0xf] }
 0x18d   :  { %v236_v23 = vadd.f32 %v235_v16, %v234_v11  ;;  %v274_v16 = vld [vmem:[#allocation2 + $0x1c] sm:$0xf] }
 0x18e   :  { %752 = vrcp.f32 %v229_v15  ;;  %v242_v24 = vrot.slane %v241_v21, 1  ;;  %v248_v26 = vadd.f32 %v247_v22, %v246_v14 }
 0x18f   :  { %754 = vrcp.f32 %v236_v23 }
 0x190   :  { %v243_v34 = vadd.f32 %v242_v24, %v241_v21  ;;  %v249_v35 = vrot.slane %v248_v26, 1 }
 0x192   :  { %v745_v28 = vpop.eup %744  ;;  %756 = vrcp.f32 %v243_v34  ;;  %v250_v40 = vadd.f32 %v249_v35, %v248_v26 }
 0x193   :  { %v747_v29 = vpop.eup %746  ;;  %v260_v30 = vmul.f32 %v745_v28, %v980_v19 }
 0x194   :  { %v259_v33 = vmul.f32 %v747_v29, %v982_v20  ;;  %758 = vrcp.f32 %v250_v40 }
 0x195   :  { %282 = vperm.xlu0 %723, %v260_v30  }
 0x196   :  { %v749_v36 = vpop.eup %748  ;;  %277 = vperm.xlu1 %722, %v259_v33  }
 0x197   :  { %v261_v37 = vmul.f32 %v749_v36, %v988_v25  ;;  %v751_v38 = vpop.eup %750 }
 0x198   :  { %v262_v41 = vmul.f32 %v751_v38, %v990_v27  ;;  %v268_v27 = vld [vmem:[#allocation2 + $0x4] sm:$0xf] }
 0x19a   :  { %287 = vperm.xlu1 %722, %v261_v37  }
 0x19b   :  { %v753_v43 = vpop.eup %752 }
 0x19c   :  { %v263_v19 = vmul.f32 %v753_v43, %v996_v39  ;;  %v755_v20 = vpop.eup %754 }
 0x19d   :  { %v264_v44 = vmul.f32 %v755_v20, %v998_v42 }
 0x19e   :  { %292 = vperm.xlu1 %722, %v262_v41  }
 0x19f   :  { %v757_v45 = vpop.eup %756 }
 0x1a0   :  { %v265_v46 = vmul.f32 %v757_v45, %v741_v53 }
 0x1a1   :  { %v759_v47 = vpop.eup %758 }
 0x1a2   :  { %297 = vperm.xlu1 %722, %v263_v19   ;;  %v266_v25 = vmul.f32 %v759_v47, %v743_v57  ;;  %v272_v57 = vld [vmem:[#allocation2 + $0x14] sm:$0xf] }
 0x1a6   :  { %302 = vperm.xlu1 %722, %v264_v44  }
 0x1aa   :  { %307 = vperm.xlu1 %722, %v265_v46  }
 0x1ae   :  { %312 = vperm.xlu1 %722, %v266_v25  }
 0x210   :  { %v283_v51 = vpop.permute.xlu0 %282 }
 0x211   :  { %v278_v48 = vpop.permute.xlu1 %277  ;;  %v316_v39 = vmul.f32 %v283_v51, %v268_v27 }
 0x212   :  { %v315_v55 = vmul.f32 %v278_v48, %v267_v50 }
 0x213   :  { %v324_v53 = vsel %vm33_vm0, %v316_v39, 0.0 }
 0x214   :  { %v323_v62 = vsel %vm33_vm0, %v315_v55, 0.0 }
 0x215   :  { %v288_v49 = vpop.permute.xlu1 %287  ;;  %v325_v2 = vadd.f32 %v324_v53, %v323_v62 }
 0x216   :  { %v317_v58 = vmul.f32 %v288_v49, %v269_v52 }
 0x218   :  { %v326_v0 = vsel %vm33_vm0, %v317_v58, 0.0 }
 0x219   :  { %v293_v54 = vpop.permute.xlu1 %292  ;;  %v327_v8 = vadd.f32 %v326_v0, %v325_v2 }
 0x21a   :  { %v318_v63 = vmul.f32 %v293_v54, %v270_v56 }
 0x21c   :  { %v328_v4 = vsel %vm33_vm0, %v318_v63, 0.0 }
 0x21d   :  { %v298_v42 = vpop.permute.xlu1 %297  ;;  %v329_v11 = vadd.f32 %v328_v4, %v327_v8 }
 0x21e   :  { %v319_v1 = vmul.f32 %v298_v42, %v271_v61 }
 0x220   :  { %v330_v10 = vsel %vm33_vm0, %v319_v1, 0.0 }
 0x221   :  { %v303_v3 = vpop.permute.xlu1 %302  ;;  %v331_v15 = vadd.f32 %v330_v10, %v329_v11 }
 0x222   :  { %v320_v7 = vmul.f32 %v303_v3, %v272_v57 }
 0x224   :  { %v332_v13 = vsel %vm33_vm0, %v320_v7, 0.0 }
 0x225   :  { %v308_v12 = vpop.permute.xlu1 %307  ;;  %v333_v22 = vadd.f32 %v332_v13, %v331_v15 }
 0x226   :  { %v321_v14 = vmul.f32 %v308_v12, %v273_v9 }
 0x228   :  { %v334_v21 = vsel %vm33_vm0, %v321_v14, 0.0 }
 0x229   :  { %v313_v23 = vpop.permute.xlu1 %312  ;;  %v335_v26 = vadd.f32 %v334_v21, %v333_v22 }
 0x22a   :  { %v322_v24 = vmul.f32 %v313_v23, %v274_v16 }
 0x22c   :  { %v336_v28 = vsel %vm33_vm0, %v322_v24, 0.0 }
 0x22d   :  { %v337_v29 = vadd.f32 %v336_v28, %v335_v26 }
 0x22f   :  { %v339_v30 = vmul.f32 %v337_v29, %v337_v29 }
 0x231   :  { %v340_v33 = vsel %vm33_vm0, %v339_v30, 0.0 }
 0x232   :  { %341 = vadd.xlane.f32.xlu1 %v340_v33 }
 0x2bb   :  { %v342_v34 = vpop.xlane.xlu1 %341 }
 0x2bc   :  { %760 = vrsqrt.f32 %v342_v34  ;;  %v350_v35 = vadd.f32 1.0, %v342_v34  ;;  %vm345_vm4 = vcmp.eq.f32.partialorder %v342_v34, inf  ;;  %v348_v38 = vand.u32 2147483648, %v342_v34 }
 0x2bd   :  { %vm347_vm5 = vcmp.eq.f32.partialorder %v342_v34, 0.0 }
 0x2be   :  { %762 = vrcp.f32 %v350_v35 }
 0x2c9   :  { %v761_v36 = vpop.eup %760 }
 0x2ca   :  { %v344_v37 = vmul.f32 %v761_v36, %v342_v34 }
 0x2cb   :  { %v763_v41 = vpop.eup %762 }
 0x2cc   :  { %v346_v40 = vsel %vm345_vm4, %v342_v34, %v344_v37 }
 0x2cd   :  { %v349_v43 = vsel %vm347_vm5, %v348_v38, %v346_v40 }
 0x2ce   :  { %v352_v19 = vmul.f32 %v763_v41, %v349_v43 }
 0x2d0   :  { %v353_v20 = vmul.f32 %v352_v19, %v337_v29 }
 0x2d2   :  { %v355_v44 = vmul.f32 %v353_v20, %v268_v27  ;;  %v354_v45 = vmul.f32 %v353_v20, %v267_v50  ;;  %v357_v25 = vmul.f32 %v353_v20, %v270_v56  ;;  %v356_v48 = vmul.f32 %v353_v20, %v269_v52 }
 0x2d3   :  { %v359_v54 = vmul.f32 %v353_v20, %v272_v57  ;;  %v358_v55 = vmul.f32 %v353_v20, %v271_v61  ;;  %v361_v27 = vmul.f32 %v353_v20, %v274_v16  ;;  %v360_v58 = vmul.f32 %v353_v20, %v273_v9 }
 0x2d4   :  { %v365_v46 = vsel %vm33_vm0, %v355_v44, 0.0  ;;  %v362_v47 = vsel %vm33_vm0, %v354_v45, 0.0  ;;  %v371_v49 = vsel %vm33_vm0, %v357_v25, 0.0  ;;  %v368_v51 = vsel %vm33_vm0, %v356_v48, 0.0 }
 0x2d5   :  { %366 = vadd.xlane.f32.xlu1 %v365_v46  ;;  %363 = vadd.xlane.f32.xlu0 %v362_v47  ;;  %v377_v39 = vsel %vm33_vm0, %v359_v54, 0.0  ;;  %v374_v50 = vsel %vm33_vm0, %v358_v55, 0.0  ;;  %v383_v52 = vsel %vm33_vm0, %v361_v27, 0.0  ;;  %v380_v56 = vsel %vm33_vm0, %v360_v58, 0.0 }
 0x2d9   :  { %372 = vadd.xlane.f32.xlu1 %v371_v49  ;;  %369 = vadd.xlane.f32.xlu0 %v368_v51 }
 0x2dd   :  { %378 = vadd.xlane.f32.xlu1 %v377_v39  ;;  %375 = vadd.xlane.f32.xlu0 %v374_v50 }
 0x2e1   :  { %384 = vadd.xlane.f32.xlu1 %v383_v52  ;;  %381 = vadd.xlane.f32.xlu0 %v380_v56 }
 0x35e   :  { %v367_v42 = vpop.xlane.xlu1 %366  ;;  %v364_v62 = vpop.xlane.xlu0 %363 }
 0x35f   :  { %v387_v61 = vadd.f32 %v367_v42, %v903_v59  ;;  %v386_v53 = vadd.f32 %v364_v62, %v908_v60 }
 0x361   :  { %395 = vst.msk [vmem:[%s1228_s2 + $0x4] sm:$0xf] %vm98_vm3, %v387_v61  ;;  %394 = vst.msk [vmem:[%s1228_s2] sm:$0xf] %vm98_vm3, %v386_v53 }
 0x362   :  { %v373_v63 = vpop.xlane.xlu1 %372  ;;  %v370_v57 = vpop.xlane.xlu0 %369 }
 0x363   :  { %v389_v0 = vadd.f32 %v373_v63, %v930_v6  ;;  %v388_v1 = vadd.f32 %v370_v57, %v925_v5 }
 0x365   :  { %397 = vst.msk [vmem:[%s1228_s2 + $0xc] sm:$0xf] %vm98_vm3, %v389_v0  ;;  %396 = vst.msk [vmem:[%s1228_s2 + $0x8] sm:$0xf] %vm98_vm3, %v388_v1 }
 0x366   :  { %v379_v59 = vpop.xlane.xlu1 %378  ;;  %v376_v60 = vpop.xlane.xlu0 %375 }
 0x367   :  { %v391_v2 = vadd.f32 %v379_v59, %v952_v18  ;;  %v390_v3 = vadd.f32 %v376_v60, %v947_v17 }
 0x368   :  { %v1054_v5 = vld [vmem:[%s1228_s2 + $0x4] sm:$0xf]  ;;  %v1059_v6 = vld [vmem:[%s1228_s2] sm:$0xf] }
 0x369   :  { %399 = vst.msk [vmem:[%s1228_s2 + $0x14] sm:$0xf] %vm98_vm3, %v391_v2  ;;  %398 = vst.msk [vmem:[%s1228_s2 + $0x10] sm:$0xf] %vm98_vm3, %v390_v3  ;;  %v417_v17 = vsel %vm98_vm3, %v1054_v5, -inf  ;;  %v410_v18 = vsel %vm98_vm3, %v1059_v6, -inf }
 0x36a   :  { %v385_v4 = vpop.xlane.xlu1 %384  ;;  %v382_v7 = vpop.xlane.xlu0 %381  ;;  %v418_v8 = vrot.slane %v417_v17, 4  ;;  %v411_v9 = vrot.slane %v410_v18, 4 }
 0x36b   :  { %v393_v10 = vadd.f32 %v385_v4, %v966_v32  ;;  %v392_v11 = vadd.f32 %v382_v7, %v961_v31 }
 0x36c   :  { %v419_v12 = vmax.f32 %v417_v17, %v418_v8  ;;  %v412_v13 = vmax.f32 %v410_v18, %v411_v9  ;;  %v1078_v14 = vld [vmem:[%s1228_s2 + $0xc] sm:$0xf]  ;;  %v1083_v15 = vld [vmem:[%s1228_s2 + $0x8] sm:$0xf] }
 0x36d   :  { %401 = vst.msk [vmem:[%s1228_s2 + $0x1c] sm:$0xf] %vm98_vm3, %v393_v10  ;;  %400 = vst.msk [vmem:[%s1228_s2 + $0x18] sm:$0xf] %vm98_vm3, %v392_v11  ;;  %v431_v31 = vsel %vm98_vm3, %v1078_v14, -inf  ;;  %v424_v32 = vsel %vm98_vm3, %v1083_v15, -inf }
 0x36e   :  { %v420_v16 = vrot.slane %v419_v12, 2  ;;  %v413_v21 = vrot.slane %v412_v13, 2  ;;  %v432_v22 = vrot.slane %v431_v31, 4  ;;  %v425_v23 = vrot.slane %v424_v32, 4 }
 0x370   :  { %v421_v24 = vmax.f32 %v419_v12, %v420_v16  ;;  %v414_v26 = vmax.f32 %v412_v13, %v413_v21  ;;  %v433_v28 = vmax.f32 %v431_v31, %v432_v22  ;;  %v426_v29 = vmax.f32 %v424_v32, %v425_v23  ;;  %v1100_v30 = vld [vmem:[%s1228_s2 + $0x14] sm:$0xf]  ;;  %v1105_v33 = vld [vmem:[%s1228_s2 + $0x10] sm:$0xf] }
 0x371   :  { %v445_v34 = vsel %vm98_vm3, %v1100_v30, -inf  ;;  %v438_v35 = vsel %vm98_vm3, %v1105_v33, -inf }
 0x372   :  { %v422_v36 = vrot.slane %v421_v24, 1  ;;  %v415_v37 = vrot.slane %v414_v26, 1  ;;  %v434_v38 = vrot.slane %v433_v28, 2  ;;  %v427_v40 = vrot.slane %v426_v29, 2 }
 0x373   :  { %v446_v41 = vrot.slane %v445_v34, 4  ;;  %v439_v43 = vrot.slane %v438_v35, 4 }
 0x374   :  { %v423_v19 = vmax.f32 %v421_v24, %v422_v36  ;;  %v416_v20 = vmax.f32 %v414_v26, %v415_v37  ;;  %v435_v44 = vmax.f32 %v433_v28, %v434_v38  ;;  %v428_v45 = vmax.f32 %v426_v29, %v427_v40  ;;  %v1114_v46 = vld [vmem:[%s1228_s2 + $0x1c] sm:$0xf]  ;;  %v1119_v47 = vld [vmem:[%s1228_s2 + $0x18] sm:$0xf] }
 0x375   :  { %v447_v25 = vmax.f32 %v445_v34, %v446_v41  ;;  %v440_v48 = vmax.f32 %v438_v35, %v439_v43  ;;  %v459_v49 = vsel %vm98_vm3, %v1114_v46, -inf  ;;  %v452_v51 = vsel %vm98_vm3, %v1119_v47, -inf }
 0x376   :  { %v467_v54 = vsub.f32 %v1054_v5, %v423_v19  ;;  %v466_v55 = vsub.f32 %v1059_v6, %v416_v20  ;;  %v436_v39 = vrot.slane %v435_v44, 1  ;;  %v429_v50 = vrot.slane %v428_v45, 1 }
 0x377   :  { %v448_v27 = vrot.slane %v447_v25, 2  ;;  %v441_v58 = vrot.slane %v440_v48, 2  ;;  %v460_v52 = vrot.slane %v459_v49, 4  ;;  %v453_v56 = vrot.slane %v452_v51, 4 }
 0x378   :  { %v476_v42 = vmul.f32 1.442695, %v467_v54  ;;  %v474_v62 = vmul.f32 1.442695, %v466_v55  ;;  %v437_v61 = vmax.f32 %v435_v44, %v436_v39  ;;  %v430_v53 = vmax.f32 %v428_v45, %v429_v50 }
 0x379   :  { %v449_v63 = vmax.f32 %v447_v25, %v448_v27  ;;  %v442_v57 = vmax.f32 %v440_v48, %v441_v58  ;;  %v461_v0 = vmax.f32 %v459_v49, %v460_v52  ;;  %v454_v1 = vmax.f32 %v452_v51, %v453_v56 }
 0x37a   :  { %764 = vpow2.f32 %v476_v42  ;;  %v469_v59 = vsub.f32 %v1078_v14, %v437_v61  ;;  %v468_v60 = vsub.f32 %v1083_v15, %v430_v53 }
 0x37b   :  { %766 = vpow2.f32 %v474_v62  ;;  %v450_v2 = vrot.slane %v449_v63, 1  ;;  %v443_v3 = vrot.slane %v442_v57, 1  ;;  %v462_v17 = vrot.slane %v461_v0, 2 }
 0x37c   :  { %v480_v18 = vmul.f32 1.442695, %v469_v59  ;;  %v478_v4 = vmul.f32 1.442695, %v468_v60  ;;  %v455_v7 = vrot.slane %v454_v1, 2 }
 0x37d   :  { %v451_v8 = vmax.f32 %v449_v63, %v450_v2  ;;  %v444_v9 = vmax.f32 %v442_v57, %v443_v3  ;;  %v463_v10 = vmax.f32 %v461_v0, %v462_v17 }
 0x37e   :  { %768 = vpow2.f32 %v480_v18  ;;  %v456_v11 = vmax.f32 %v454_v1, %v455_v7 }
 0x37f   :  { %770 = vpow2.f32 %v478_v4  ;;  %v471_v12 = vsub.f32 %v1100_v30, %v451_v8  ;;  %v470_v13 = vsub.f32 %v1105_v33, %v444_v9  ;;  %v464_v31 = vrot.slane %v463_v10, 1 }
 0x380   :  { %v457_v32 = vrot.slane %v456_v11, 1 }
 0x381   :  { %v484_v16 = vmul.f32 1.442695, %v471_v12  ;;  %v482_v21 = vmul.f32 1.442695, %v470_v13  ;;  %v465_v22 = vmax.f32 %v463_v10, %v464_v31 }
 0x382   :  { %v458_v23 = vmax.f32 %v456_v11, %v457_v32 }
 0x383   :  { %772 = vpow2.f32 %v484_v16  ;;  %v473_v24 = vsub.f32 %v1114_v46, %v465_v22 }
 0x384   :  { %774 = vpow2.f32 %v482_v21  ;;  %v472_v26 = vsub.f32 %v1119_v47, %v458_v23 }
 0x385   :  { %v488_v28 = vmul.f32 1.442695, %v473_v24 }
 0x386   :  { %v486_v29 = vmul.f32 1.442695, %v472_v26 }
 0x387   :  { %v1133_v34 = vpop.eup %764  ;;  %776 = vpow2.f32 %v488_v28 }
 0x388   :  { %v1135_v35 = vpop.eup %766  ;;  %v497_v36 = vsel %vm98_vm3, %v1133_v34, 0.0  ;;  %778 = vpow2.f32 %v486_v29 }
 0x389   :  { %v498_v37 = vrot.slane %v497_v36, 4  ;;  %v490_v38 = vsel %vm98_vm3, %v1135_v35, 0.0 }
 0x38a   :  { %v491_v40 = vrot.slane %v490_v38, 4 }
 0x38b   :  { %v1141_v41 = vpop.eup %768  ;;  %v499_v43 = vadd.f32 %v498_v37, %v497_v36 }
 0x38c   :  { %v1143_v19 = vpop.eup %770  ;;  %v492_v20 = vadd.f32 %v491_v40, %v490_v38  ;;  %v511_v44 = vsel %vm98_vm3, %v1141_v41, 0.0 }
 0x38d   :  { %v500_v45 = vrot.slane %v499_v43, 2  ;;  %v512_v25 = vrot.slane %v511_v44, 4  ;;  %v504_v48 = vsel %vm98_vm3, %v1143_v19, 0.0 }
 0x38e   :  { %v493_v49 = vrot.slane %v492_v20, 2  ;;  %v505_v51 = vrot.slane %v504_v48, 4 }
 0x38f   :  { %v501_v54 = vadd.f32 %v500_v45, %v499_v43  ;;  %v513_v55 = vadd.f32 %v512_v25, %v511_v44 }
 0x390   :  { %v1149_v39 = vpop.eup %772  ;;  %v494_v50 = vadd.f32 %v493_v49, %v492_v20  ;;  %v506_v27 = vadd.f32 %v505_v51, %v504_v48 }
 0x391   :  { %v1151_v58 = vpop.eup %774  ;;  %v502_v52 = vrot.slane %v501_v54, 1  ;;  %v514_v56 = vrot.slane %v513_v55, 2  ;;  %v525_v42 = vsel %vm98_vm3, %v1149_v39, 0.0 }
 0x392   :  { %v495_v62 = vrot.slane %v494_v50, 1  ;;  %v507_v61 = vrot.slane %v506_v27, 2  ;;  %v526_v53 = vrot.slane %v525_v42, 4  ;;  %v518_v63 = vsel %vm98_vm3, %v1151_v58, 0.0 }
 0x393   :  { %v503_v57 = vadd.f32 %v502_v52, %v501_v54  ;;  %v515_v0 = vadd.f32 %v514_v56, %v513_v55  ;;  %v519_v1 = vrot.slane %v518_v63, 4 }
 0x394   :  { %v777_v59 = vpop.eup %776  ;;  %v496_v60 = vadd.f32 %v495_v62, %v494_v50  ;;  %v508_v2 = vadd.f32 %v507_v61, %v506_v27  ;;  %v527_v3 = vadd.f32 %v526_v53, %v525_v42 }
 0x395   :  { %v779_v17 = vpop.eup %778  ;;  %780 = vrcp.f32 %v503_v57  ;;  %v516_v18 = vrot.slane %v515_v0, 1  ;;  %v520_v4 = vadd.f32 %v519_v1, %v518_v63  ;;  %v539_v7 = vsel %vm98_vm3, %v777_v59, 0.0  ;;  %v563_v63 = vld [vmem:[#allocation2 + $0x4] sm:$0xf] }
 0x396   :  { %782 = vrcp.f32 %v496_v60  ;;  %v509_v8 = vrot.slane %v508_v2, 1  ;;  %v528_v9 = vrot.slane %v527_v3, 2  ;;  %v540_v10 = vrot.slane %v539_v7, 4  ;;  %v564_v60 = vld [vmem:[#allocation2 + $0x8] sm:$0xf] }
 0x397   :  { %v517_v11 = vadd.f32 %v516_v18, %v515_v0  ;;  %v521_v12 = vrot.slane %v520_v4, 2  ;;  %v532_v13 = vsel %vm98_vm3, %v779_v17, 0.0 }
 0x398   :  { %v510_v31 = vadd.f32 %v509_v8, %v508_v2  ;;  %v529_v32 = vadd.f32 %v528_v9, %v527_v3  ;;  %v541_v16 = vadd.f32 %v540_v10, %v539_v7  ;;  %v533_v21 = vrot.slane %v532_v13, 4  ;;  %v565_v2 = vld [vmem:[#allocation2 + $0xc] sm:$0xf]  ;;  %v566_v8 = vld [vmem:[#allocation2 + $0x10] sm:$0xf] }
 0x399   :  { %784 = vrcp.f32 %v517_v11  ;;  %v522_v22 = vadd.f32 %v521_v12, %v520_v4  ;;  %v567_v9 = vld [vmem:[#allocation2 + $0x14] sm:$0xf] }
 0x39a   :  { %786 = vrcp.f32 %v510_v31  ;;  %v530_v23 = vrot.slane %v529_v32, 1  ;;  %v542_v24 = vrot.slane %v541_v16, 2  ;;  %v534_v26 = vadd.f32 %v533_v21, %v532_v13 }
 0x39b   :  { %v523_v28 = vrot.slane %v522_v22, 1 }
 0x39c   :  { %v531_v29 = vadd.f32 %v530_v23, %v529_v32  ;;  %v543_v36 = vadd.f32 %v542_v24, %v541_v16  ;;  %v535_v37 = vrot.slane %v534_v26, 2  ;;  %v569_v23 = vld [vmem:[#allocation2 + $0x1c] sm:$0xf] }
 0x39d   :  { %v524_v38 = vadd.f32 %v523_v28, %v522_v22  ;;  %v568_v22 = vld [vmem:[#allocation2 + $0x18] sm:$0xf] }
 0x39e   :  { %788 = vrcp.f32 %v531_v29  ;;  %v544_v40 = vrot.slane %v543_v36, 1  ;;  %v536_v43 = vadd.f32 %v535_v37, %v534_v26 }
 0x39f   :  { %790 = vrcp.f32 %v524_v38 }
 0x3a0   :  { %v545_v20 = vadd.f32 %v544_v40, %v543_v36  ;;  %v537_v44 = vrot.slane %v536_v43, 1 }
 0x3a2   :  { %v781_v45 = vpop.eup %780  ;;  %792 = vrcp.f32 %v545_v20  ;;  %v538_v25 = vadd.f32 %v537_v44, %v536_v43 }
 0x3a3   :  { %v783_v48 = vpop.eup %782  ;;  %v555_v49 = vmul.f32 %v781_v45, %v1133_v34 }
 0x3a4   :  { %v554_v51 = vmul.f32 %v783_v48, %v1135_v35  ;;  %794 = vrcp.f32 %v538_v25 }
 0x3a5   :  { %577 = vperm.xlu1 %722, %v555_v49  }
 0x3a6   :  { %v785_v54 = vpop.eup %784  ;;  %572 = vperm.xlu0 %723, %v554_v51  }
 0x3a7   :  { %v787_v55 = vpop.eup %786  ;;  %v557_v50 = vmul.f32 %v785_v54, %v1141_v41  ;;  %v562_v41 = vld [vmem:[#allocation2] sm:$0xf] }
 0x3a8   :  { %v556_v27 = vmul.f32 %v787_v55, %v1143_v19 }
 0x3aa   :  { %587 = vperm.xlu0 %723, %v557_v50   ;;  %582 = vperm.xlu1 %722, %v556_v27  }
 0x3ab   :  { %v789_v52 = vpop.eup %788 }
 0x3ac   :  { %v791_v56 = vpop.eup %790  ;;  %v559_v42 = vmul.f32 %v789_v52, %v1149_v39 }
 0x3ad   :  { %v558_v62 = vmul.f32 %v791_v56, %v1151_v58 }
 0x3ae   :  { %597 = vperm.xlu0 %723, %v559_v42  }
 0x3af   :  { %v793_v34 = vpop.eup %792  ;;  %592 = vperm.xlu1 %722, %v558_v62  }
 0x3b0   :  { %v561_v35 = vmul.f32 %v793_v34, %v777_v59 }
 0x3b1   :  { %v795_v61 = vpop.eup %794 }
 0x3b2   :  { %607 = vperm.xlu0 %723, %v561_v35   ;;  %v560_v53 = vmul.f32 %v795_v61, %v779_v17 }
 0x3b4   :  { %602 = vperm.xlu1 %722, %v560_v53  }
 0x420   :  { %v578_v57 = vpop.permute.xlu1 %577 }
 0x421   :  { %v611_v19 = vmul.f32 %v578_v57, %v563_v63  ;;  %v573_v0 = vpop.permute.xlu0 %572 }
 0x422   :  { %v610_v1 = vmul.f32 %v573_v0, %v562_v41 }
 0x423   :  { %v619_v39 = vsel %vm33_vm0, %v611_v19, 0.0 }
 0x424   :  { %v618_v58 = vsel %vm33_vm0, %v610_v1, 0.0 }
 0x425   :  { %v583_v3 = vpop.permute.xlu1 %582  ;;  %v588_v18 = vpop.permute.xlu0 %587  ;;  %v620_v7 = vadd.f32 %v619_v39, %v618_v58 }
 0x426   :  { %v612_v4 = vmul.f32 %v583_v3, %v564_v60  ;;  %v613_v59 = vmul.f32 %v588_v18, %v565_v2 }
 0x428   :  { %v621_v17 = vsel %vm33_vm0, %v612_v4, 0.0  ;;  %v623_v12 = vsel %vm33_vm0, %v613_v59, 0.0 }
 0x429   :  { %v622_v10 = vadd.f32 %v621_v17, %v620_v7  ;;  %v598_v11 = vpop.permute.xlu0 %597 }
 0x42a   :  { %v593_v13 = vpop.permute.xlu1 %592  ;;  %v615_v16 = vmul.f32 %v598_v11, %v567_v9 }
 0x42b   :  { %v624_v31 = vadd.f32 %v623_v12, %v622_v10  ;;  %v614_v32 = vmul.f32 %v593_v13, %v566_v8 }
 0x42c   :  { %v627_v28 = vsel %vm33_vm0, %v615_v16, 0.0 }
 0x42d   :  { %v625_v21 = vsel %vm33_vm0, %v614_v32, 0.0  ;;  %v608_v24 = vpop.permute.xlu0 %607 }
 0x42e   :  { %v626_v26 = vadd.f32 %v625_v21, %v624_v31  ;;  %v617_v38 = vmul.f32 %v608_v24, %v569_v23 }
 0x42f   :  { %v603_v29 = vpop.permute.xlu1 %602 }
 0x430   :  { %v628_v36 = vadd.f32 %v627_v28, %v626_v26  ;;  %v616_v37 = vmul.f32 %v603_v29, %v568_v22  ;;  %v631_v20 = vsel %vm33_vm0, %v617_v38, 0.0 }
 0x432   :  { %v629_v40 = vsel %vm33_vm0, %v616_v37, 0.0 }
 0x433   :  { %v630_v43 = vadd.f32 %v629_v40, %v628_v36 }
 0x435   :  { %v632_v44 = vadd.f32 %v631_v20, %v630_v43 }
 0x437   :  { %v634_v45 = vmul.f32 %v632_v44, %v632_v44 }
 0x439   :  { %v635_v25 = vsel %vm33_vm0, %v634_v45, 0.0 }
 0x43a   :  { %636 = vadd.xlane.f32.xlu1 %v635_v25 }
 0x4c3   :  { %v637_v48 = vpop.xlane.xlu1 %636 }
 0x4c4   :  { %796 = vrsqrt.f32 %v637_v48  ;;  %v645_v49 = vadd.f32 1.0, %v637_v48  ;;  %vm640_vm6 = vcmp.eq.f32.partialorder %v637_v48, inf  ;;  %v643_v55 = vand.u32 2147483648, %v637_v48 }
 0x4c5   :  { %vm642_vm7 = vcmp.eq.f32.partialorder %v637_v48, 0.0 }
 0x4c6   :  { %798 = vrcp.f32 %v645_v49 }
 0x4d1   :  { %v797_v51 = vpop.eup %796 }
 0x4d2   :  { %v639_v54 = vmul.f32 %v797_v51, %v637_v48 }
 0x4d3   :  { %v799_v27 = vpop.eup %798 }
 0x4d4   :  { %v641_v50 = vsel %vm640_vm6, %v637_v48, %v639_v54 }
 0x4d5   :  { %v644_v52 = vsel %vm642_vm7, %v643_v55, %v641_v50 }
 0x4d6   :  { %v647_v56 = vmul.f32 %v799_v27, %v644_v52 }
 0x4d8   :  { %v648_v42 = vmul.f32 %v647_v56, %v632_v44 }
 0x4da   :  { %697 = vst.msk [vmem:[#allocation5] sm:$0xf] %vm33_vm0, %v648_v42  ;;  %v651_v62 = vmul.f32 %v648_v42, %v564_v60  ;;  %v649_v34 = vmul.f32 %v648_v42, %v562_v41  ;;  %v653_v53 = vmul.f32 %v648_v42, %v566_v8  ;;  %v650_v57 = vmul.f32 %v648_v42, %v563_v63 }
 0x4db   :  { %v655_v1 = vmul.f32 %v648_v42, %v568_v22  ;;  %v652_v39 = vmul.f32 %v648_v42, %v565_v2  ;;  %v654_v60 = vmul.f32 %v648_v42, %v567_v9  ;;  %v656_v63 = vmul.f32 %v648_v42, %v569_v23 }
 0x4dc   :  { %v663_v35 = vsel %vm33_vm0, %v651_v62, 0.0  ;;  %v657_v61 = vsel %vm33_vm0, %v649_v34, 0.0  ;;  %v669_v19 = vsel %vm33_vm0, %v653_v53, 0.0  ;;  %v660_v0 = vsel %vm33_vm0, %v650_v57, 0.0 }
 0x4dd   :  { %664 = vadd.xlane.f32.xlu1 %v663_v35  ;;  %658 = vadd.xlane.f32.xlu0 %v657_v61  ;;  %v675_v58 = vsel %vm33_vm0, %v655_v1, 0.0  ;;  %v666_v41 = vsel %vm33_vm0, %v652_v39, 0.0  ;;  %v672_v3 = vsel %vm33_vm0, %v654_v60, 0.0  ;;  %v678_v18 = vsel %vm33_vm0, %v656_v63, 0.0 }
 0x4e1   :  { %670 = vadd.xlane.f32.xlu1 %v669_v19  ;;  %661 = vadd.xlane.f32.xlu0 %v660_v0 }
 0x4e5   :  { %676 = vadd.xlane.f32.xlu1 %v675_v58  ;;  %667 = vadd.xlane.f32.xlu0 %v666_v41 }
 0x4e9   :  { %673 = vadd.xlane.f32.xlu0 %v672_v3 }
 0x4ed   :  { %679 = vadd.xlane.f32.xlu0 %v678_v18 }
 0x4ee   :  { %831 = shalt.err (!%p828_p9)
}
 0x4ef   :  { %707 = dma.vmem_to_hbm [thread:$0]  %s705_s22, 64, %s1227_s1, [#allocation4]  }
 0x566   :  { %v665_v2 = vpop.xlane.xlu1 %664  ;;  %v659_v4 = vpop.xlane.xlu0 %658 }
 0x567   :  { %v683_v59 = vadd.f32 %v665_v2, %v1083_v15  ;;  %v681_v7 = vadd.f32 %v659_v4, %v1059_v6 }
 0x569   :  { %691 = vst.msk [vmem:[%s1228_s2 + $0x8] sm:$0xf] %vm98_vm3, %v683_v59  ;;  %689 = vst.msk [vmem:[%s1228_s2] sm:$0xf] %vm98_vm3, %v681_v7 }
 0x56a   :  { %v671_v17 = vpop.xlane.xlu1 %670  ;;  %v662_v8 = vpop.xlane.xlu0 %661 }
 0x56b   :  { %v685_v9 = vadd.f32 %v671_v17, %v1105_v33  ;;  %v682_v10 = vadd.f32 %v662_v8, %v1054_v5 }
 0x56d   :  { %693 = vst.msk [vmem:[%s1228_s2 + $0x10] sm:$0xf] %vm98_vm3, %v685_v9  ;;  %690 = vst.msk [vmem:[%s1228_s2 + $0x4] sm:$0xf] %vm98_vm3, %v682_v10 }
 0x56e   :  { %v677_v6 = vpop.xlane.xlu1 %676  ;;  %v668_v15 = vpop.xlane.xlu0 %667 }
 0x56f   :  { %v687_v11 = vadd.f32 %v677_v6, %v1119_v47  ;;  %v684_v12 = vadd.f32 %v668_v15, %v1078_v14 }
 0x571   :  { %695 = vst.msk [vmem:[%s1228_s2 + $0x18] sm:$0xf] %vm98_vm3, %v687_v11  ;;  %692 = vst.msk [vmem:[%s1228_s2 + $0xc] sm:$0xf] %vm98_vm3, %v684_v12 }
 0x572   :  { %v674_v5 = vpop.xlane.xlu0 %673 }
 0x573   :  { %v686_v33 = vadd.f32 %v674_v5, %v1100_v30 }
 0x575   :  { %694 = vst.msk [vmem:[%s1228_s2 + $0x14] sm:$0xf] %vm98_vm3, %v686_v33 }
 0x576   :  { %v680_v47 = vpop.xlane.xlu0 %679 }
 0x577   :  { %v688_v14 = vadd.f32 %v680_v47, %v1114_v46 }
 0x579   :  { %696 = vst.msk [vmem:[%s1228_s2 + $0x1c] sm:$0xf] %vm98_vm3, %v688_v14 }
 0x57a   :  { %842 = dma.done.wait [#allocation4], 64  }
 0x57b   :  { %843 = vsyncadd [#allocation4], 4294967232 }
 0x57c   :  { %715 = vsyncpa [#allocation3], 1 }
 0x57d   :  { %716 = vsyncpa [#allocation4], 1 }

</bundles_post_ra>
